<compile_context>
chip_gen: v7x
topology: tpu7x:2x2x1
jax: 0.10.0
libtpu: 0.0.40
codegen_flags: <defaults>
</compile_context>

<pallas_src>
import jax
import jax.numpy as jnp
from jax.experimental import pallas as pl
from jax.experimental.pallas import tpu as pltpu

INPUT_DIM = 784
HIDDEN_DIM = 150
OUTPUT_DIM = 10

D_HID_PAD = 256   # 150 -> 2 * 128 (lane-dense hidden activation)
D_OUT_PAD = 128   # 10  -> 1 * 128 (lane-dense, unmasked output store)

TB_MAX = 1024     # per-step working set (double-buffered f32 x tile + bf16 out tile
                  # + resident weights) is ~10 MB at TB=1024, well under the 32 MiB
                  # scoped-VMEM default on every generation (v5e/v6e/v7x).


def _round_up(n, m):
    return ((n + m - 1) // m) * m


def _choose_tb(batch):
    """Adaptive batch tile.

    Small batches: tile ~= batch so latency scales with B, not a tile constant.
    Large batches: 256..1024 rows, sized so the grid has >= 2 steps (so the
    'parallel' batch axis can shard across both TensorCores on v7x)."""
    if batch <= 256:
        return max(8, _round_up(batch, 16))
    return min(TB_MAX, _round_up(pl.cdiv(batch, 2), 256))


def mlp_kernel(x_ref, w1_ref, b1_ref, w2_ref, b2_ref, o_ref):
    # In-kernel f32 -> bf16 cast (VPU work, fully hidden under the x DMA).
    x = x_ref[...].astype(jnp.bfloat16)
    # fc1 on the MXU: bf16 x bf16 -> f32 accumulation.
    h = jnp.dot(x, w1_ref[...], preferred_element_type=jnp.float32)
    h = jnp.maximum(h + b1_ref[...], 0.0)                     # bias + ReLU in f32
    # fc2: cast the activation back to bf16 for the MXU, accumulate in f32.
    out = jnp.dot(h.astype(jnp.bfloat16), w2_ref[...],
                  preferred_element_type=jnp.float32)
    o_ref[...] = (out + b2_ref[...]).astype(o_ref.dtype)      # bf16 lane-dense store


@jax.jit
def network_forward(x, w1_p, b1_p, w2_p, b2_p):
    """x: [B, 784] f32; padded params from pad_params(). Returns [B, 10] f32."""
    B = x.shape[0]
    tb = _choose_tb(B)                 # static (trace-time) tile choice
    grid = (pl.cdiv(B, tb),)           # partial last tile: OOB rows read garbage,
                                       # OOB output writes are dropped (rows independent)

    out_p = pl.pallas_call(
        mlp_kernel,
        out_shape=jax.ShapeDtypeStruct((B, D_OUT_PAD), jnp.bfloat16),
        grid=grid,
        in_specs=[
            # x batch tile: last dim == full array dim (784) -> legal, no padding copy.
            pl.BlockSpec((tb, INPUT_DIM), lambda i: (i, 0)),
            # Weights / biases: constant index_maps -> VMEM-resident across all steps.
            pl.BlockSpec((INPUT_DIM, D_HID_PAD), lambda i: (0, 0)),
            pl.BlockSpec((1, D_HID_PAD), lambda i: (0, 0)),
            pl.BlockSpec((D_HID_PAD, D_OUT_PAD), lambda i: (0, 0)),
            pl.BlockSpec((1, D_OUT_PAD), lambda i: (0, 0)),
        ],
        out_specs=pl.BlockSpec((tb, D_OUT_PAD), lambda i: (i, 0)),
        compiler_params=pltpu.CompilerParams(
            dimension_semantics=("parallel",),   # independent batch tiles -> dual-TC on v7x
        ),
    )(x, w1_p, b1_p, w2_p, b2_p)

    # Padded output lanes (cols 10..127) are exactly zero (zero-padded w2/b2);
    # slice them off and hand back f32.
    return out_p[:, :OUTPUT_DIM].astype(jnp.float32)


def init_params(key):
    """Deterministic init mirroring PyTorch nn.Linear default
    (uniform in [-1/sqrt(fan_in), 1/sqrt(fan_in)]), in ORIGINAL (unpadded) shapes.
    Weights are stored transposed ([in, out]) for plain row-major matmuls."""
    k1, k2, k3, k4 = jax.random.split(key, 4)
    bound1 = 1.0 / jnp.sqrt(INPUT_DIM)
    bound2 = 1.0 / jnp.sqrt(HIDDEN_DIM)
    w1_t = jax.random.uniform(k1, (INPUT_DIM, HIDDEN_DIM), jnp.float32,
                              minval=-bound1, maxval=bound1)
    b1 = jax.random.uniform(k2, (HIDDEN_DIM,), jnp.float32,
                            minval=-bound1, maxval=bound1)
    w2_t = jax.random.uniform(k3, (HIDDEN_DIM, OUTPUT_DIM), jnp.float32,
                              minval=-bound2, maxval=bound2)
    b2 = jax.random.uniform(k4, (OUTPUT_DIM,), jnp.float32,
                            minval=-bound2, maxval=bound2)
    return w1_t, b1, w2_t, b2


def pad_params(w1_t, b1, w2_t, b2):
    """Zero-pad params to lane-aligned (hidden=256, out=128) shapes; weights in bf16,
    biases in f32.  Zero padding guarantees padded hidden/output lanes are exactly 0."""
    w1_p = jnp.zeros((INPUT_DIM, D_HID_PAD), jnp.bfloat16)
    w1_p = w1_p.at[:, :HIDDEN_DIM].set(w1_t.astype(jnp.bfloat16))
    b1_p = jnp.zeros((1, D_HID_PAD), jnp.float32).at[0, :HIDDEN_DIM].set(b1)
    w2_p = jnp.zeros((D_HID_PAD, D_OUT_PAD), jnp.bfloat16)
    w2_p = w2_p.at[:HIDDEN_DIM, :OUTPUT_DIM].set(w2_t.astype(jnp.bfloat16))
    b2_p = jnp.zeros((1, D_OUT_PAD), jnp.float32).at[0, :OUTPUT_DIM].set(b2)
    return w1_p, b1_p, w2_p, b2_p


if __name__ == "__main__":
    key = jax.random.PRNGKey(0)
    k_params, k_x = jax.random.split(key)

    w1_t, b1, w2_t, b2 = init_params(k_params)
    w1_p, b1_p, w2_p, b2_p = pad_params(w1_t, b1, w2_t, b2)

    batch = 8
    x = jax.random.normal(k_x, (batch, INPUT_DIM), dtype=jnp.float32)

    out = network_forward(x, w1_p, b1_p, w2_p, b2_p)
    out = jax.block_until_ready(out)

    # Reference in plain f32 JAX: fc2(relu(fc1(x))). Tolerance accounts for bf16
    # rounding of x/weights/hidden activation and the bf16 output store.
    ref = jnp.maximum(x @ w1_t + b1[None, :], 0.0) @ w2_t + b2[None, :]
    assert out.shape == (batch, OUTPUT_DIM)
    assert jnp.allclose(out, ref, atol=3e-2, rtol=3e-2), (
        f"max abs err = {jnp.max(jnp.abs(out - ref))}")

    print("KERNEL_OK")
</pallas_src>

<mosaic_0001>
module attributes {stable_mosaic.version = 11 : i64} {
  func.func @mlp_kernel(%arg0: i32, %arg1: memref<16x784xf32, #tpu.memory_space<vmem>>, %arg2: memref<784x256xbf16, #tpu.memory_space<vmem>>, %arg3: memref<1x256xf32, #tpu.memory_space<vmem>>, %arg4: memref<256x128xbf16, #tpu.memory_space<vmem>>, %arg5: memref<1x128xf32, #tpu.memory_space<vmem>>, %arg6: memref<16x128xbf16, #tpu.memory_space<vmem>>) attributes {dimension_semantics = [#tpu.dimension_semantics<parallel>], iteration_bounds = array<i64: 1>, scalar_prefetch = 0 : i64, scratch_operands = 0 : i64, tpu.core_type = #tpu.core_type<tc>, window_params = [{transform_indices = @transform_0, window_bounds = array<i64: 16, 784>}, {pipeline_mode = #tpu.pipeline_mode<synchronous>, transform_indices = @transform_1, window_bounds = array<i64: 784, 256>}, {pipeline_mode = #tpu.pipeline_mode<synchronous>, transform_indices = @transform_2, window_bounds = array<i64: 1, 256>}, {pipeline_mode = #tpu.pipeline_mode<synchronous>, transform_indices = @transform_3, window_bounds = array<i64: 256, 128>}, {pipeline_mode = #tpu.pipeline_mode<synchronous>, transform_indices = @transform_4, window_bounds = array<i64: 1, 128>}, {transform_indices = @transform_5, window_bounds = array<i64: 16, 128>}]} {
    %c0 = arith.constant 0 : index
    %c0_0 = arith.constant 0 : index
    %0 = vector.load %arg1[%c0, %c0_0] : memref<16x784xf32, #tpu.memory_space<vmem>>, vector<16x784xf32>
    %1 = arith.truncf %0 : vector<16x784xf32> to vector<16x784xbf16>
    %c0_1 = arith.constant 0 : index
    %c0_2 = arith.constant 0 : index
    %2 = vector.load %arg2[%c0_1, %c0_2] : memref<784x256xbf16, #tpu.memory_space<vmem>>, vector<784x256xbf16>
    %cst = arith.constant dense<0.000000e+00> : vector<16x256xf32>
    %3 = tpu.matmul %1, %2, %cst {dimension_numbers = #tpu.dot_dimension_numbers<[1], [0], [0], [1], [0, 0, 1, 1], [], []>} : vector<16x784xbf16>, vector<784x256xbf16>, vector<16x256xf32> -> vector<16x256xf32>
    %c0_3 = arith.constant 0 : index
    %c0_4 = arith.constant 0 : index
    %4 = vector.load %arg3[%c0_3, %c0_4] : memref<1x256xf32, #tpu.memory_space<vmem>>, vector<1x256xf32>
    %5 = vector.broadcast %4 : vector<1x256xf32> to vector<16x256xf32>
    %6 = arith.addf %3, %5 : vector<16x256xf32>
    %cst_5 = arith.constant 0.000000e+00 : f32
    %7 = vector.broadcast %cst_5 : f32 to vector<16x256xf32>
    %8 = arith.maximumf %6, %7 : vector<16x256xf32>
    %9 = arith.truncf %8 : vector<16x256xf32> to vector<16x256xbf16>
    %c0_6 = arith.constant 0 : index
    %c0_7 = arith.constant 0 : index
    %10 = vector.load %arg4[%c0_6, %c0_7] : memref<256x128xbf16, #tpu.memory_space<vmem>>, vector<256x128xbf16>
    %cst_8 = arith.constant dense<0.000000e+00> : vector<16x128xf32>
    %11 = tpu.matmul %9, %10, %cst_8 {dimension_numbers = #tpu.dot_dimension_numbers<[1], [0], [0], [1], [0, 0, 1, 1], [], []>} : vector<16x256xbf16>, vector<256x128xbf16>, vector<16x128xf32> -> vector<16x128xf32>
    %c0_9 = arith.constant 0 : index
    %c0_10 = arith.constant 0 : index
    %12 = vector.load %arg5[%c0_9, %c0_10] : memref<1x128xf32, #tpu.memory_space<vmem>>, vector<1x128xf32>
    %13 = vector.broadcast %12 : vector<1x128xf32> to vector<16x128xf32>
    %14 = arith.addf %11, %13 : vector<16x128xf32>
    %15 = arith.truncf %14 : vector<16x128xf32> to vector<16x128xbf16>
    %c0_11 = arith.constant 0 : index
    %c0_12 = arith.constant 0 : index
    %16 = vector.load %arg6[%c0_11, %c0_12] : memref<16x128xbf16, #tpu.memory_space<vmem>>, vector<16x128xbf16>
    tpu.vector_store %arg6[%c0_11, %c0_12], %15 {strides = array<i32>} : memref<16x128xbf16, #tpu.memory_space<vmem>>, vector<16x128xbf16>,
    return
  }
  func.func @transform_0(%arg0: i32) -> (i32, i32) {
    %c0_i32 = arith.constant 0 : i32
    %c0_i32_0 = arith.constant 0 : i32
    return %arg0, %c0_i32 : i32, i32
  }
  func.func @transform_1(%arg0: i32) -> (i32, i32) {
    %c0_i32 = arith.constant 0 : i32
    %c0_i32_0 = arith.constant 0 : i32
    %c0_i32_1 = arith.constant 0 : i32
    return %c0_i32, %c0_i32_0 : i32, i32
  }
  func.func @transform_2(%arg0: i32) -> (i32, i32) {
    %c0_i32 = arith.constant 0 : i32
    %c0_i32_0 = arith.constant 0 : i32
    %c0_i32_1 = arith.constant 0 : i32
    return %c0_i32, %c0_i32_0 : i32, i32
  }
  func.func @transform_3(%arg0: i32) -> (i32, i32) {
    %c0_i32 = arith.constant 0 : i32
    %c0_i32_0 = arith.constant 0 : i32
    %c0_i32_1 = arith.constant 0 : i32
    return %c0_i32, %c0_i32_0 : i32, i32
  }
  func.func @transform_4(%arg0: i32) -> (i32, i32) {
    %c0_i32 = arith.constant 0 : i32
    %c0_i32_0 = arith.constant 0 : i32
    %c0_i32_1 = arith.constant 0 : i32
    return %c0_i32, %c0_i32_0 : i32, i32
  }
  func.func @transform_5(%arg0: i32) -> (i32, i32) {
    %c0_i32 = arith.constant 0 : i32
    %c0_i32_0 = arith.constant 0 : i32
    return %arg0, %c0_i32 : i32, i32
  }
}

</mosaic_0001>

<bundles_post_ra>
// kernel: network_forward.1
= control target key start
LH: loop header
LB: loop body
LE: loop exit
PB: predicated region body
PF: predicated region fallthrough
CT: control target
= control target key end

     0   :  { %10 = vsyncpa [#allocation3], 0  ;;  %s1583_s0 = inlined_call_operand.hbm [shape: f32[8,784], index: 0, kind: input, shape index: {}]   ;;  %s1584_s1 = inlined_call_operand.hbm [shape: bf16[784,256], index: 1, kind: input, shape index: {}]   ;;  %s1585_s2 = inlined_call_operand.vmem [shape: f32[1,256], index: 2, kind: input, shape index: {}]   ;;  %s1586_s3 = inlined_call_operand.hbm [shape: bf16[256,128], index: 3, kind: input, shape index: {}]   ;;  %s1587_s4 = inlined_call_operand.vmem [shape: f32[1,128], index: 4, kind: input, shape index: {}]   ;;  %s1588_s5 = inlined_call_operand.vmem [shape: bf16[8,128], index: 5, kind: output, shape index: {}]  }
   0x1   :  { %11 = vsyncpa [#allocation5], 0 }
   0x2   :  { %16 = vsyncadd [#allocation3], 896  ;;  %s1498_s18 = smov [#allocation4]   ;;  %s1428_s22 = scalar_lea.hbm %s1584_s1, 12544 }
   0x3   :  { %s29_s19 = sshll.u32 %s1498_s18, 4  ;;  %p1429_p0 = scmp.ne.s32.totalorder %s1584_s1, %s1428_s22  ;;  %s30_s19 = int_to_ptr.vmem [resolvable:$true] %s29_s19 }
   0x4   :  { %p1432_p1 = scmp.lt.u32.totalorder %s1428_s22, %s1584_s1 }
   0x6   :  { %p1434_p2 = pnand %p1432_p1, %p1429_p0 }
   0x8   :  { %1437 = shalt.err (!%p1434_p2)
}
   0x9   :  { %s1438_s27 = scalar_lea.vmem %s30_s19, 12544  ;;  %p1443_p4 = scmp.lt.s32.totalorder %s30_s19, %s30_s19 }
   0xa   :  { %p1439_p3 = scmp.ne.s32.totalorder %s30_s19, %s1438_s27  ;;  %p1444_p5 = scmp.lt.s32.totalorder %s1438_s27, %s1438_s27 }
   0xc   :  { %p1445_p6 = por %p1444_p5, %p1443_p4 }
   0xe   :  { %p1446_p7 = pnand %p1445_p6, %p1439_p3 }
  0x10   :  { %1449 = shalt.err (!%p1446_p7)
}
  0x11   :  { %s1499_s28 = smov 128   ;;  %s1500_s29 = smov 8  }
  0x12   :  { %35 = dma.hbm_to_vmem [thread:$0]  %s1584_s1, 12544, %s30_s19, [#allocation5], %s1499_s28, %s1499_s28, %s1500_s29  }
  0x13   :  { %s1501_s7 = smov [#allocation2]   ;;  %s1450_s11 = scalar_lea.hbm %s1583_s0, 896 }
  0x14   :  { %s17_s8 = sshll.u32 %s1501_s7, 4  ;;  %p1451_p8 = scmp.ne.s32.totalorder %s1583_s0, %s1450_s11  ;;  %s18_s8 = int_to_ptr.vmem [resolvable:$true] %s17_s8 }
  0x15   :  { %p1454_p9 = scmp.lt.u32.totalorder %s1450_s11, %s1583_s0 }
  0x17   :  { %p1456_p10 = pnand %p1454_p9, %p1451_p8 }
  0x19   :  { %1459 = shalt.err (!%p1456_p10)
}
  0x1a   :  { %s1460_s16 = scalar_lea.vmem %s18_s8, 896  ;;  %s1464_s1 = scalar_lea.vmem %s18_s8, 1792 }
  0x1b   :  { %p1461_p11 = scmp.ne.s32.totalorder %s18_s8, %s1460_s16  ;;  %p1465_p12 = scmp.lt.s32.totalorder %s18_s8, %s18_s8 }
  0x1c   :  { %p1466_p13 = scmp.lt.s32.totalorder %s1464_s1, %s1460_s16 }
  0x1e   :  { %p1467_p0 = por %p1466_p13, %p1465_p12 }
  0x20   :  { %p1468_p1 = pnand %p1467_p0, %p1461_p11 }
  0x22   :  { %1471 = shalt.err (!%p1468_p1)
}
  0x23   :  { %s1502_s17 = smov 896   ;;  %s1503_s18 = smov 56  }
  0x24   :  { %23 = dma.hbm_to_vmem [thread:$0]  %s1583_s0, 896, %s18_s8, [#allocation3], %s1502_s17, %s1502_s17, %s1503_s18  }
  0x25   :  { %s1504_s21 = smov [#allocation6]   ;;  %s1472_s25 = scalar_lea.hbm %s1586_s3, 2048 }
  0x26   :  { %s43_s22 = sshll.u32 %s1504_s21, 4  ;;  %p1473_p2 = scmp.ne.s32.totalorder %s1586_s3, %s1472_s25  ;;  %s44_s22 = int_to_ptr.vmem [resolvable:$true] %s43_s22 }
  0x27   :  { %p1476_p3 = scmp.lt.u32.totalorder %s1472_s25, %s1586_s3 }
  0x29   :  { %p1478_p4 = pnand %p1476_p3, %p1473_p2 }
  0x2b   :  { %1481 = shalt.err (!%p1478_p4)
}
  0x2c   :  { %s1482_s30 = scalar_lea.vmem %s44_s22, 2048  ;;  %p1487_p6 = scmp.lt.s32.totalorder %s44_s22, %s44_s22 }
  0x2d   :  { %p1483_p5 = scmp.ne.s32.totalorder %s44_s22, %s1482_s30  ;;  %p1488_p7 = scmp.lt.s32.totalorder %s1482_s30, %s1482_s30 }
  0x2f   :  { %p1489_p8 = por %p1488_p7, %p1487_p6 }
  0x31   :  { %p1490_p9 = pnand %p1489_p8, %p1483_p5 }
  0x33   :  { %1493 = shalt.err (!%p1490_p9)
}
  0x34   :  { %s1505_s0 = smov 64   ;;  %s1506_s6 = smov 4  }
  0x35   :  { %49 = dma.hbm_to_vmem [thread:$0]  %s1586_s3, 2048, %s44_s22, [#allocation5], %s1505_s0, %s1505_s0, %s1506_s6  }
  0x36   :  { %1494 = dma.done.wait [#allocation3], 1792  }
  0x37   :  { %1495 = vsyncadd [#allocation3], 4294965504 }
  0x38   :  { %1496 = dma.done.wait [#allocation5], 14592  }
  0x39   :  { %1497 = vsyncadd [#allocation5], 4294952704  ;;  %v1265_v0 = vld [vmem:[#allocation4 + $0x104] ss:$8 sps:$4 sm:$0xff]   ;;  %v1267_v1 = vld [vmem:[#allocation4 + $0x100] ss:$8 sps:$4 sm:$0xff]  }
  0x3a   :  { %730 = vmatprep.subr.bf16.mxu0 %v1265_v0  ;;  %v1268_v2 = vld [vmem:[#allocation4 + $0x114] ss:$8 sps:$4 sm:$0xff]   ;;  %v1270_v3 = vld [vmem:[#allocation4 + $0x110] ss:$8 sps:$4 sm:$0xff]   ;;  %v1271_v4 = vld [vmem:[#allocation4 + $0x124] ss:$8 sps:$4 sm:$0xff]  }
  0x3b   :  { %731 = vmatpush1.bf16.msra.mxu0 %v1267_v1  ;;  %v1273_v5 = vld [vmem:[#allocation4 + $0x120] ss:$8 sps:$4 sm:$0xff]   ;;  %v1274_v6 = vld [vmem:[#allocation4 + $0x134] ss:$8 sps:$4 sm:$0xff]   ;;  %v1276_v7 = vld [vmem:[#allocation4 + $0x130] ss:$8 sps:$4 sm:$0xff]  }
  0x3c   :  { %732 = vmatprep.subr.bf16.mxu0 %v1268_v2  ;;  %v1277_v8 = vld [vmem:[#allocation4 + $0x144] ss:$8 sps:$4 sm:$0xff]   ;;  %v1279_v9 = vld [vmem:[#allocation4 + $0x140] ss:$8 sps:$4 sm:$0xff]   ;;  %v1280_v10 = vld [vmem:[#allocation4 + $0x154] ss:$8 sps:$4 sm:$0xff]  }
  0x3d   :  { %v1282_v11 = vld [vmem:[#allocation4 + $0x150] ss:$8 sps:$4 sm:$0xff]   ;;  %v1307_v12 = vld [vmem:[#allocation4 + $0x4] ss:$8 sps:$4 sm:$0xff]   ;;  %v1309_v13 = vld [vmem:[#allocation4] ss:$8 sps:$4 sm:$0xff]  }
  0x3e   :  { %v1283_v14 = vld [vmem:[#allocation4 + $0x164] ss:$8 sps:$4 sm:$0xff]   ;;  %687 = vmatprep.subr.bf16.mxu1 %v1307_v12  ;;  %v1313_v15 = vld [vmem:[#allocation4 + $0x14] ss:$8 sps:$4 sm:$0xff]   ;;  %v1315_v16 = vld [vmem:[#allocation4 + $0x10] ss:$8 sps:$4 sm:$0xff]  }
  0x3f   :  { %733 = vmatpush1.bf16.msra.mxu0 %v1270_v3  ;;  %688 = vmatpush1.bf16.msra.mxu1 %v1309_v13  ;;  %v1285_v17 = vld [vmem:[#allocation4 + $0x160] ss:$8 sps:$4 sm:$0xff]   ;;  %v1286_v18 = vld [vmem:[#allocation4 + $0x174] ss:$8 sps:$4 sm:$0xff]   ;;  %v1319_v19 = vld [vmem:[#allocation4 + $0x24] ss:$8 sps:$4 sm:$0xff]  }
  0x40   :  { %734 = vmatprep.subr.bf16.mxu0 %v1271_v4  ;;  %689 = vmatprep.subr.bf16.mxu1 %v1313_v15  ;;  %v65_v20 = vld [vmem:[#allocation2 + $0x18] sm:$0xff]  ;;  %v72_v21 = vld [vmem:[#allocation2 + $0x50] sm:$0xff]  ;;  %v1288_v24 = vld [vmem:[#allocation4 + $0x170] ss:$8 sps:$4 sm:$0xff]   ;;  %vm683_vm0 = vcmask 130048  }
  0x41   :  { %v1321_v22 = vld [vmem:[#allocation4 + $0x20] ss:$8 sps:$4 sm:$0xff]   ;;  %v79_v23 = vpack.c.bf16 %v72_v21, %v65_v20  ;;  %v1289_v25 = vld [vmem:[#allocation4 + $0x184] ss:$8 sps:$4 sm:$0xff]   ;;  %v1325_v26 = vld [vmem:[#allocation4 + $0x34] ss:$8 sps:$4 sm:$0xff]  }
  0x42   :  { %v1327_v27 = vld [vmem:[#allocation4 + $0x30] ss:$8 sps:$4 sm:$0xff]   ;;  %v1291_v28 = vld [vmem:[#allocation4 + $0x180] ss:$8 sps:$4 sm:$0xff]   ;;  %v1331_v29 = vld [vmem:[#allocation4 + $0x44] ss:$8 sps:$4 sm:$0xff]  }
  0x43   :  { %735 = vmatpush1.bf16.msra.mxu0 %v1273_v5  ;;  %690 = vmatpush1.bf16.msra.mxu1 %v1315_v16  ;;  %v1292_v30 = vld [vmem:[#allocation4 + $0x194] ss:$8 sps:$4 sm:$0xff]   ;;  %v1333_v31 = vld [vmem:[#allocation4 + $0x40] ss:$8 sps:$4 sm:$0xff]   ;;  %v1294_v32 = vld [vmem:[#allocation4 + $0x190] ss:$8 sps:$4 sm:$0xff]  }
  0x44   :  { %736 = vmatprep.subr.bf16.mxu0 %v1274_v6  ;;  %691 = vmatprep.subr.bf16.mxu1 %v1319_v19  ;;  %v1337_v33 = vld [vmem:[#allocation4 + $0x54] ss:$8 sps:$4 sm:$0xff]   ;;  %v1295_v34 = vld [vmem:[#allocation4 + $0x1a4] ss:$8 sps:$4 sm:$0xff]   ;;  %v1339_v35 = vld [vmem:[#allocation4 + $0x50] ss:$8 sps:$4 sm:$0xff]  }
  0x45   :  { %762 = vmatprep.mubr.bf16.mxu0 %v79_v23  ;;  %v1297_v36 = vld [vmem:[#allocation4 + $0x1a0] ss:$8 sps:$4 sm:$0xff]   ;;  %v1343_v37 = vld [vmem:[#allocation4 + $0x64] ss:$8 sps:$4 sm:$0xff]   ;;  %v1298_v38 = vld [vmem:[#allocation4 + $0x1b4] ss:$8 sps:$4 sm:$0xff]  }
  0x46   :  { %v1345_v39 = vld [vmem:[#allocation4 + $0x60] ss:$8 sps:$4 sm:$0xff]   ;;  %v1300_v40 = vld [vmem:[#allocation4 + $0x1b0] ss:$8 sps:$4 sm:$0xff]   ;;  %v1349_v41 = vld [vmem:[#allocation4 + $0x74] ss:$8 sps:$4 sm:$0xff]  }
  0x47   :  { %737 = vmatpush1.bf16.msra.mxu0 %v1276_v7  ;;  %692 = vmatpush1.bf16.msra.mxu1 %v1321_v22  ;;  %v1301_v42 = vld [vmem:[#allocation4 + $0x1c4] ss:$8 sps:$4 sm:$0xff]   ;;  %v1351_v43 = vld [vmem:[#allocation4 + $0x70] ss:$8 sps:$4 sm:$0xff]   ;;  %v1303_v44 = vld [vmem:[#allocation4 + $0x1c0] ss:$8 sps:$4 sm:$0xff]  }
  0x48   :  { %738 = vmatprep.subr.bf16.mxu0 %v1277_v8  ;;  %693 = vmatprep.subr.bf16.mxu1 %v1325_v26  ;;  %v1355_v45 = vld [vmem:[#allocation4 + $0x84] ss:$8 sps:$4 sm:$0xff]   ;;  %v1304_v46 = vld [vmem:[#allocation4 + $0x1d4] ss:$8 sps:$4 sm:$0xff]   ;;  %v1357_v47 = vld [vmem:[#allocation4 + $0x80] ss:$8 sps:$4 sm:$0xff]  }
  0x49   :  { %v1306_v48 = vld [vmem:[#allocation4 + $0x1d0] ss:$8 sps:$4 sm:$0xff]   ;;  %v1361_v49 = vld [vmem:[#allocation4 + $0x94] ss:$8 sps:$4 sm:$0xff]   ;;  %v1310_v50 = vld [vmem:[#allocation4 + $0x1e4] ss:$8 sps:$4 sm:$0xff]  }
  0x4a   :  { %v1363_v51 = vld [vmem:[#allocation4 + $0x90] ss:$8 sps:$4 sm:$0xff]   ;;  %v1312_v52 = vld [vmem:[#allocation4 + $0x1e0] ss:$8 sps:$4 sm:$0xff]   ;;  %v1367_v53 = vld [vmem:[#allocation4 + $0xa4] ss:$8 sps:$4 sm:$0xff]  }
  0x4b   :  { %739 = vmatpush1.bf16.msra.mxu0 %v1279_v9  ;;  %694 = vmatpush1.bf16.msra.mxu1 %v1327_v27  ;;  %v1316_v54 = vld [vmem:[#allocation4 + $0x1f4] ss:$8 sps:$4 sm:$0xff]   ;;  %v1318_v55 = vld [vmem:[#allocation4 + $0x1f0] ss:$8 sps:$4 sm:$0xff]   ;;  %v64_v56 = vld [vmem:[#allocation2 + $0x10] sm:$0xff] }
  0x4c   :  { %740 = vmatprep.subr.bf16.mxu0 %v1280_v10  ;;  %695 = vmatprep.subr.bf16.mxu1 %v1331_v29  ;;  %v1369_v57 = vld [vmem:[#allocation4 + $0xa0] ss:$8 sps:$4 sm:$0xff]   ;;  %v71_v58 = vld [vmem:[#allocation2 + $0x48] sm:$0xff]  ;;  %v1324_v60 = vld [vmem:[#allocation4 + $0x204] ss:$8 sps:$4 sm:$0xff]  }
  0x4d   :  { %v1373_v59 = vld [vmem:[#allocation4 + $0xb4] ss:$8 sps:$4 sm:$0xff]   ;;  %v78_v61 = vpack.c.bf16 %v71_v58, %v64_v56  ;;  %v1375_v62 = vld [vmem:[#allocation4 + $0xb0] ss:$8 sps:$4 sm:$0xff]   ;;  %v1322_v0 = vld [vmem:[#allocation4 + $0x200] ss:$8 sps:$4 sm:$0xff]  }
  0x4e   :  { %v63_v63 = vld [vmem:[#allocation2 + $0x8] sm:$0xff]  ;;  %v1379_v1 = vld [vmem:[#allocation4 + $0xc4] ss:$8 sps:$4 sm:$0xff]   ;;  %v70_v2 = vld [vmem:[#allocation2 + $0x40] sm:$0xff] }
  0x4f   :  { %741 = vmatpush1.bf16.msra.mxu0 %v1282_v11  ;;  %696 = vmatpush1.bf16.msra.mxu1 %v1333_v31  ;;  %v1330_v3 = vld [vmem:[#allocation4 + $0x214] ss:$8 sps:$4 sm:$0xff]   ;;  %v77_v4 = vpack.c.bf16 %v70_v2, %v63_v63  ;;  %v1381_v5 = vld [vmem:[#allocation4 + $0xc0] ss:$8 sps:$4 sm:$0xff]   ;;  %v1328_v6 = vld [vmem:[#allocation4 + $0x210] ss:$8 sps:$4 sm:$0xff]  }
  0x50   :  { %742 = vmatprep.subr.bf16.mxu0 %v1283_v14  ;;  %697 = vmatprep.subr.bf16.mxu1 %v1337_v33  ;;  %v1385_v7 = vld [vmem:[#allocation4 + $0xd4] ss:$8 sps:$4 sm:$0xff]   ;;  %v1336_v8 = vld [vmem:[#allocation4 + $0x224] ss:$8 sps:$4 sm:$0xff]   ;;  %v1334_v11 = vld [vmem:[#allocation4 + $0x220] ss:$8 sps:$4 sm:$0xff]  }
  0x51   :  { %719 = vmatprep.mubr.bf16.mxu1 %v77_v4  ;;  %v67_v9 = vld [vmem:[#allocation2 + $0x28] sm:$0xff]  ;;  %v74_v10 = vld [vmem:[#allocation2 + $0x60] sm:$0xff]  ;;  %v1391_v14 = vld [vmem:[#allocation4 + $0xe4] ss:$8 sps:$4 sm:$0xff]   ;;  %v1507_v31 = vmov 0  }
  0x52   :  { %v81_v12 = vpack.c.bf16 %v74_v10, %v67_v9  ;;  %v1387_v13 = vld [vmem:[#allocation4 + $0xd0] ss:$8 sps:$4 sm:$0xff]   ;;  %v1342_v15 = vld [vmem:[#allocation4 + $0x234] ss:$8 sps:$4 sm:$0xff]   ;;  %v69_v22 = vld [vmem:[#allocation2 + $0x38] sm:$0xff] }
  0x53   :  { %743 = vmatpush1.bf16.msra.mxu0 %v1285_v17  ;;  %698 = vmatpush1.bf16.msra.mxu1 %v1339_v35  ;;  %v1340_v16 = vld [vmem:[#allocation4 + $0x230] ss:$8 sps:$4 sm:$0xff]   ;;  %v1348_v17 = vld [vmem:[#allocation4 + $0x244] ss:$8 sps:$4 sm:$0xff]   ;;  %v1397_v19 = vld [vmem:[#allocation4 + $0xf4] ss:$8 sps:$4 sm:$0xff]  }
  0x54   :  { %744 = vmatprep.subr.bf16.mxu0 %v1286_v18  ;;  %699 = vmatprep.subr.bf16.mxu1 %v1343_v37  ;;  %v1393_v18 = vld [vmem:[#allocation4 + $0xe0] ss:$8 sps:$4 sm:$0xff]   ;;  %v1399_v20 = vld [vmem:[#allocation4 + $0xf0] ss:$8 sps:$4 sm:$0xff]   ;;  %v1366_v35 = vld [vmem:[#allocation4 + $0x274] ss:$8 sps:$4 sm:$0xff]  }
  0x55   :  { %v62_v21 = vld [vmem:[#allocation2] sm:$0xff]  ;;  %v1346_v23 = vld [vmem:[#allocation4 + $0x240] ss:$8 sps:$4 sm:$0xff]   ;;  %v75_v33 = vld [vmem:[#allocation2 + $0x68] sm:$0xff] }
  0x56   :  { %v1406_v26 = vld [vmem:[#allocation4 + $0x300] ss:$8 sps:$4 sm:$0xff]   ;;  %v76_v27 = vpack.c.bf16 %v69_v22, %v62_v21  ;;  %v1412_v29 = vld [vmem:[#allocation6 + $0x40] sm:$0xff]   ;;  %v1422_v2 = vld [vmem:[#allocation6 + $0x68] sm:$0xff]  }
  0x57   :  { %745 = vmatpush1.bf16.msra.mxu0 %v1288_v24  ;;  %700 = vmatpush1.bf16.msra.mxu1 %v1345_v39  ;;  %v1408_v24 = vld [vmem:[#allocation4 + $0x304] ss:$8 sps:$4 sm:$0xff]   ;;  %v1413_v37 = vld [vmem:[#allocation6] sm:$0xff]   ;;  %v1414_v39 = vld [vmem:[#allocation6 + $0x48] sm:$0xff]  }
  0x58   :  { %746 = vmatprep.subr.bf16.mxu0 %v1289_v25  ;;  %701 = vmatprep.subr.bf16.mxu1 %v1349_v41  ;;  %v1354_v25 = vld [vmem:[#allocation4 + $0x254] ss:$8 sps:$4 sm:$0xff]   ;;  %v1403_v56 = vld [vmem:[#allocation4 + $0x2e0] ss:$8 sps:$4 sm:$0xff]   ;;  %v1409_v58 = vld [vmem:[#allocation4 + $0x2f0] ss:$8 sps:$4 sm:$0xff]  }
  0x59   :  { %v1415_v41 = vld [vmem:[#allocation6 + $0x8] sm:$0xff]   ;;  %v1419_v63 = vld [vmem:[#allocation6 + $0x18] sm:$0xff]   ;;  %v1424_v4 = vld [vmem:[#allocation6 + $0x70] sm:$0xff]  }
  0x5b   :  { %747 = vmatpush1.bf16.msra.mxu0 %v1291_v28  ;;  %702 = vmatpush1.bf16.msra.mxu1 %v1351_v43  ;;  %v1352_v28 = vld [vmem:[#allocation4 + $0x250] ss:$8 sps:$4 sm:$0xff]   ;;  %v1416_v43 = vld [vmem:[#allocation6 + $0x50] sm:$0xff]  }
  0x5c   :  { %748 = vmatprep.subr.bf16.mxu0 %v1292_v30  ;;  %703 = vmatprep.subr.bf16.mxu1 %v1355_v45  ;;  %v1360_v30 = vld [vmem:[#allocation4 + $0x264] ss:$8 sps:$4 sm:$0xff]  }
  0x5d   :  { %v1417_v45 = vld [vmem:[#allocation6 + $0x10] sm:$0xff]  }
  0x5f   :  { %749 = vmatpush1.bf16.msra.mxu0 %v1294_v32  ;;  %704 = vmatpush1.bf16.msra.mxu1 %v1357_v47  ;;  %v68_v32 = vld [vmem:[#allocation2 + $0x30] sm:$0xff] }
  0x60   :  { %750 = vmatprep.subr.bf16.mxu0 %v1295_v34  ;;  %705 = vmatprep.subr.bf16.mxu1 %v1361_v49  ;;  %v1358_v34 = vld [vmem:[#allocation4 + $0x260] ss:$8 sps:$4 sm:$0xff]   ;;  %v1384_v47 = vld [vmem:[#allocation4 + $0x2a4] ss:$8 sps:$4 sm:$0xff]   ;;  %v1390_v49 = vld [vmem:[#allocation4 + $0x2b4] ss:$8 sps:$4 sm:$0xff]  }
  0x63   :  { %751 = vmatpush1.bf16.msra.mxu0 %v1297_v36  ;;  %706 = vmatpush1.bf16.msra.mxu1 %v1363_v51  ;;  %v82_v36 = vpack.c.bf16 %v75_v33, %v68_v32  ;;  %v1396_v51 = vld [vmem:[#allocation4 + $0x2c4] ss:$8 sps:$4 sm:$0xff]  }
  0x64   :  { %752 = vmatprep.subr.bf16.mxu0 %v1298_v38  ;;  %707 = vmatprep.subr.bf16.mxu1 %v1367_v53  ;;  %v1364_v38 = vld [vmem:[#allocation4 + $0x270] ss:$8 sps:$4 sm:$0xff]   ;;  %v1402_v53 = vld [vmem:[#allocation4 + $0x2d4] ss:$8 sps:$4 sm:$0xff]  }
  0x67   :  { %753 = vmatpush1.bf16.msra.mxu0 %v1300_v40  ;;  %708 = vmatpush1.bf16.msra.mxu1 %v1369_v57  ;;  %v1372_v40 = vld [vmem:[#allocation4 + $0x284] ss:$8 sps:$4 sm:$0xff]   ;;  %v1411_v57 = vld [vmem:[#allocation4 + $0x2f4] ss:$8 sps:$4 sm:$0xff]  }
  0x68   :  { %754 = vmatprep.subr.bf16.mxu0 %v1301_v42  ;;  %709 = vmatprep.subr.bf16.mxu1 %v1373_v59  ;;  %v1370_v42 = vld [vmem:[#allocation4 + $0x280] ss:$8 sps:$4 sm:$0xff]   ;;  %v66_v59 = vld [vmem:[#allocation2 + $0x20] sm:$0xff] }
  0x6b   :  { %755 = vmatpush1.bf16.msra.mxu0 %v1303_v44  ;;  %710 = vmatpush1.bf16.msra.mxu1 %v1375_v62  ;;  %v1378_v44 = vld [vmem:[#allocation4 + $0x294] ss:$8 sps:$4 sm:$0xff]   ;;  %v1418_v62 = vld [vmem:[#allocation6 + $0x58] sm:$0xff]  }
  0x6c   :  { %756 = vmatprep.subr.bf16.mxu0 %v1304_v46  ;;  %711 = vmatprep.subr.bf16.mxu1 %v1379_v1  ;;  %v1376_v46 = vld [vmem:[#allocation4 + $0x290] ss:$8 sps:$4 sm:$0xff]  }
  0x6d   :  { %v1421_v1 = vld [vmem:[#allocation6 + $0x20] sm:$0xff]  }
  0x6f   :  { %757 = vmatpush1.bf16.msra.mxu0 %v1306_v48  ;;  %712 = vmatpush1.bf16.msra.mxu1 %v1381_v5  ;;  %v1382_v48 = vld [vmem:[#allocation4 + $0x2a0] ss:$8 sps:$4 sm:$0xff]  }
  0x70   :  { %758 = vmatprep.subr.bf16.mxu0 %v1310_v50  ;;  %713 = vmatprep.subr.bf16.mxu1 %v1385_v7  ;;  %v1388_v50 = vld [vmem:[#allocation4 + $0x2b0] ss:$8 sps:$4 sm:$0xff]   ;;  %v1425_v5 = vld [vmem:[#allocation6 + $0x30] sm:$0xff]   ;;  %v1427_v7 = vld [vmem:[#allocation6 + $0x38] sm:$0xff]  }
  0x73   :  { %759 = vmatpush1.bf16.msra.mxu0 %v1312_v52  ;;  %714 = vmatpush1.bf16.msra.mxu1 %v1387_v13  ;;  %v1394_v52 = vld [vmem:[#allocation4 + $0x2c0] ss:$8 sps:$4 sm:$0xff]  }
  0x74   :  { %760 = vmatprep.subr.bf16.mxu0 %v1316_v54  ;;  %715 = vmatprep.subr.bf16.mxu1 %v1391_v14  ;;  %v1400_v54 = vld [vmem:[#allocation4 + $0x2d0] ss:$8 sps:$4 sm:$0xff]  }
  0x77   :  { %761 = vmatpush1.bf16.msra.mxu0 %v1318_v55  ;;  %716 = vmatpush1.bf16.msra.mxu1 %v1393_v18  ;;  %v1405_v55 = vld [vmem:[#allocation4 + $0x2e4] ss:$8 sps:$4 sm:$0xff]  }
  0x78   :  { %773 = vmatprep.subr.bf16.mxu0 %v1324_v60  ;;  %717 = vmatprep.subr.bf16.mxu1 %v1397_v19  ;;  %v73_v60 = vld [vmem:[#allocation2 + $0x58] sm:$0xff]  ;;  %v181_v19 = vld [vmem:[%s1585_s2] sm:$0x3] }
  0x7a   :  { %763 = vmatmul.mubr.bf16.vlgmr.msra.gmra.mrb[0].mxu0 %v78_v61  ;;  %v80_v61 = vpack.c.bf16 %v73_v60, %v66_v59 }
  0x7b   :  { %774 = vmatpush1.bf16.msra.mxu0 %v1322_v0  ;;  %805 = vmatprep.mubr.bf16.mxu0 %v81_v12  ;;  %v1420_v0 = vld [vmem:[#allocation6 + $0x60] sm:$0xff]  }
  0x7c   :  { %775 = vmatprep.subr.bf16.mxu0 %v1330_v3  ;;  %718 = vmatpush1.bf16.msra.mxu1 %v1399_v20  ;;  %v1423_v3 = vld [vmem:[#allocation6 + $0x28] sm:$0xff]  }
  0x7d   :  { %816 = vmatprep.subr.bf16.mxu1 %v1408_v24 }
  0x7f   :  { %776 = vmatpush1.bf16.msra.mxu0 %v1328_v6  ;;  %720 = vmatmul.mubr.bf16.vlgmr.msra.gmra.mrb[0].mxu1 %v76_v27  ;;  %v1426_v6 = vld [vmem:[#allocation6 + $0x78] sm:$0xff]  }
  0x80   :  { %777 = vmatprep.subr.bf16.mxu0 %v1336_v8  ;;  %817 = vmatpush1.bf16.msra.mxu1 %v1406_v26 }
  0x81   :  { %848 = vmatprep.mubr.bf16.mxu1 %v1507_v31  ;;  %1217 = vmatprep.subr.bf16.mxu1 %v1412_v29 }
  0x83   :  { %778 = vmatpush1.bf16.msra.mxu0 %v1334_v11 }
  0x84   :  { %779 = vmatprep.subr.bf16.mxu0 %v1342_v15 }
  0x87   :  { %780 = vmatpush1.bf16.msra.mxu0 %v1340_v16  ;;  %1190 = vmatmul.mubr.msk.bf16.vlgmr.msra.gmra.mrb[4].mxu1 %vm683_vm0, %v82_v36  ;;  %v183_v16 = vlaneseq }
  0x88   :  { %781 = vmatprep.subr.bf16.mxu0 %v1348_v17  ;;  %1218 = vmatpush3.bf16.msra.mxu1 %v1413_v37 }
  0x89   :  { %1219 = vmatprep.subr.bf16.mxu1 %v1414_v39  ;;  %v184_v17 = vshrl.u32 %v183_v16, 7 }
  0x8b   :  { %782 = vmatpush1.bf16.msra.mxu0 %v1346_v23  ;;  %v185_v18 = vsub.s32 0, %v184_v17  ;;  %v189_v20 = vsub.s32 1, %v184_v17 }
  0x8c   :  { %783 = vmatprep.subr.bf16.mxu0 %v1354_v25  ;;  %1220 = vmatpush3.bf16.msra.mxu1 %v1415_v41 }
  0x8d   :  { %1221 = vmatprep.subr.bf16.mxu1 %v1416_v43  ;;  %v186_v21 = vrot.slane %v181_v19, %v185_v18  ;;  %v190_v22 = vrot.slane %v181_v19, %v189_v20 }
  0x8f   :  { %784 = vmatpush1.bf16.msra.mxu0 %v1352_v28 }
  0x90   :  { %785 = vmatprep.subr.bf16.mxu0 %v1360_v30  ;;  %1222 = vmatpush3.bf16.msra.mxu1 %v1417_v45 }
  0x91   :  { %1223 = vmatprep.subr.bf16.mxu1 %v1418_v62 }
  0x93   :  { %786 = vmatpush1.bf16.msra.mxu0 %v1358_v34 }
  0x94   :  { %787 = vmatprep.subr.bf16.mxu0 %v1366_v35  ;;  %1224 = vmatpush3.bf16.msra.mxu1 %v1419_v63 }
  0x95   :  { %1225 = vmatprep.subr.bf16.mxu1 %v1420_v0 }
  0x97   :  { %788 = vmatpush1.bf16.msra.mxu0 %v1364_v38 }
  0x98   :  { %789 = vmatprep.subr.bf16.mxu0 %v1372_v40  ;;  %1226 = vmatpush3.bf16.msra.mxu1 %v1421_v1 }
  0x99   :  { %1227 = vmatprep.subr.bf16.mxu1 %v1422_v2 }
  0x9b   :  { %790 = vmatpush1.bf16.msra.mxu0 %v1370_v42 }
  0x9c   :  { %791 = vmatprep.subr.bf16.mxu0 %v1378_v44  ;;  %1228 = vmatpush3.bf16.msra.mxu1 %v1423_v3 }
  0x9d   :  { %1229 = vmatprep.subr.bf16.mxu1 %v1424_v4 }
  0x9f   :  { %792 = vmatpush1.bf16.msra.mxu0 %v1376_v46 }
  0xa0   :  { %793 = vmatprep.subr.bf16.mxu0 %v1384_v47  ;;  %1230 = vmatpush3.bf16.msra.mxu1 %v1425_v5 }
  0xa1   :  { %1231 = vmatprep.subr.bf16.mxu1 %v1426_v6 }
  0xa3   :  { %794 = vmatpush1.bf16.msra.mxu0 %v1382_v48 }
  0xa4   :  { %795 = vmatprep.subr.bf16.mxu0 %v1390_v49  ;;  %1232 = vmatpush3.bf16.msra.mxu1 %v1427_v7  ;;  %v1191_v49 = vld [vmem:[%s1587_s4] ss:$0 sm:$0xff] }
  0xa7   :  { %796 = vmatpush1.bf16.msra.mxu0 %v1388_v50 }
  0xa8   :  { %797 = vmatprep.subr.bf16.mxu0 %v1396_v51 }
  0xab   :  { %798 = vmatpush1.bf16.msra.mxu0 %v1394_v52 }
  0xac   :  { %799 = vmatprep.subr.bf16.mxu0 %v1402_v53 }
  0xaf   :  { %800 = vmatpush1.bf16.msra.mxu0 %v1400_v54 }
  0xb0   :  { %801 = vmatprep.subr.bf16.mxu0 %v1405_v55 }
  0xb3   :  { %802 = vmatpush1.bf16.msra.mxu0 %v1403_v56 }
  0xb4   :  { %803 = vmatprep.subr.bf16.mxu0 %v1411_v57 }
  0xb7   :  { %804 = vmatpush1.bf16.msra.mxu0 %v1409_v58 }
  0xba   :  { %806 = vmatmul.mubr.bf16.vlgmr.msra.gmra.mrb[0].mxu0 %v80_v61 }
 0x152   :  { %v721_v8 = vpop.f32.mrb[0].mxu1 }
 0x153   :  { %v723_v9 = vpop.f32.mrb[1].mxu1  ;;  %v722_v23 = vadd.f32 %v721_v8, %v186_v21 }
 0x154   :  { %v725_v10 = vpop.f32.mrb[2].mxu1  ;;  %v724_v24 = vadd.f32 %v723_v9, %v190_v22 }
 0x155   :  { %v727_v11 = vpop.f32.mrb[3].mxu1  ;;  %v726_v26 = vadd.f32 %v725_v10, %v186_v21 }
 0x156   :  { %v728_v29 = vadd.f32 %v727_v11, %v190_v22 }
 0x15a   :  { %v850_v12 = vpop.f32.mrb[4].mxu1 }
 0x15b   :  { %v852_v13 = vpop.f32.mrb[5].mxu1 }
 0x15c   :  { %v854_v14 = vpop.f32.mrb[6].mxu1 }
 0x15d   :  { %v856_v15 = vpop.f32.mrb[7].mxu1 }
 0x18d   :  { %v807_v25 = vpop.f32.mrb[0].mxu0 }
 0x18e   :  { %v1240_v27 = vadd.f32 %v807_v25, %v722_v23  ;;  %v809_v28 = vpop.f32.mrb[1].mxu0 }
 0x18f   :  { %v1243_v30 = vadd.f32 %v809_v28, %v724_v24  ;;  %v811_v31 = vpop.f32.mrb[2].mxu0 }
 0x190   :  { %v1241_v32 = vadd.f32 %v1240_v27, %v850_v12  ;;  %v1246_v33 = vadd.f32 %v811_v31, %v726_v26  ;;  %v813_v34 = vpop.f32.mrb[3].mxu0 }
 0x191   :  { %v1244_v35 = vadd.f32 %v1243_v30, %v852_v13  ;;  %v1249_v36 = vadd.f32 %v813_v34, %v728_v29 }
 0x192   :  { %v1247_v37 = vadd.f32 %v1246_v33, %v854_v14  ;;  %v859_v39 = vmax.f32 %v1241_v32, 0.0 }
 0x193   :  { %v1250_v38 = vadd.f32 %v1249_v36, %v856_v15  ;;  %v860_v41 = vmax.f32 %v1244_v35, 0.0 }
 0x194   :  { %v861_v40 = vmax.f32 %v1247_v37, 0.0 }
 0x195   :  { %v862_v42 = vmax.f32 %v1250_v38, 0.0 }
 0x196   :  { %v863_v43 = vpack.c.bf16 %v861_v40, %v859_v39 }
 0x197   :  { %v864_v44 = vpack.c.bf16 %v862_v42, %v860_v41 }
 0x199   :  { %1032 = vmatprep.mubr.bf16.mxu1 %v864_v44 }
 0x19a   :  { %1033 = vmatmul.mubr.bf16.vlgmr.msra.gmra.mrb[8].mxu1 %v863_v43 }
 0x26d   :  { %v1233_v45 = vpop.f32.mrb[8].mxu1 }
 0x26e   :  { %v1234_v46 = vpop.f32.mrb[9].mxu1 }
 0x26f   :  { %v1235_v47 = vadd.f32 %v1234_v46, %v1233_v45  ;;  %v1236_v48 = vpop.f32.mrb[10].mxu1 }
 0x270   :  { %v1237_v50 = vpop.f32.mrb[11].mxu1 }
 0x271   :  { %v1238_v51 = vadd.f32 %v1237_v50, %v1236_v48  ;;  %v1035_v52 = vadd.f32 %v1235_v47, %v1191_v49 }
 0x273   :  { %v1038_v53 = vadd.f32 %v1238_v51, %v1191_v49 }
 0x275   :  { %v1215_v54 = vpack.c.bf16 %v1038_v53, %v1035_v52 }
 0x277   :  { %1216 = vst [vmem:[#allocation7] sm:$0xff] %v1215_v54  }
 0x27e   :  { %v1068_v55 = vld [vmem:[#allocation7] sm:$0xf] }
 0x27f   :  { %1069 = vst [vmem:[%s1588_s5] sm:$0xf] %v1068_v55 }
 0x280   :  { %1086 = vsyncpa [#allocation3], 1 }
 0x281   :  { %1087 = vsyncpa [#allocation5], 1 }

</bundles_post_ra>
